<compile_context>
chip_gen: v6e
topology: v6e:2x2x1
jax: 0.10.0
libtpu: 0.0.40
codegen_flags: <defaults>
</compile_context>

<pallas_src>
import functools

import jax
import jax.numpy as jnp
from jax.experimental import pallas as pl
from jax.experimental.pallas import tpu as pltpu


def _product_kernel(x_ref, o_ref, *, n: int, k: int, chunk_lanes: int):
    """x_ref: (TM, k*2n) rows; each row holds k (even, odd) region pairs,
    segment g occupying lanes [g*2n, (g+1)*2n) as [x1_g | x2_g].

    o_ref: (TM, k*n*n) lane-dense output with, for flat segment t = g*n + i,
           o[:, t*n : (t+1)*n] = x1_g[:, i:i+1] + x2_g.
    """
    x = x_ref[...]
    two_n = 2 * n
    total_lanes = k * n * n
    segs_per_chunk = chunk_lanes // n
    num_chunks = total_lanes // chunk_lanes

    # Pre-slice the k "odd" blocks once (each is reused n times).
    x2 = [x[:, g * two_n + n: (g + 1) * two_n] for g in range(k)]

    # Static unroll: one direct store per 128-lane (or n*n) chunk.
    for c in range(num_chunks):
        parts = []
        for s in range(segs_per_chunk):
            t = c * segs_per_chunk + s
            g, i = divmod(t, n)
            base = g * two_n
            x1_col = x[:, base + i: base + i + 1]      # (TM, 1) lane-broadcast
            parts.append(x1_col + x2[g])               # (TM, n)
        chunk = parts[0] if len(parts) == 1 else jnp.concatenate(parts, axis=-1)
        o_ref[:, c * chunk_lanes: (c + 1) * chunk_lanes] = chunk


def _round_up(v: int, m: int) -> int:
    return -(-v // m) * m


def _sublane_multiple(dtype) -> int:
    # f32 -> 8, bf16/f16 -> 16, int8/fp8 -> 32 (sub-32-bit packs along sublanes).
    itemsize = jnp.dtype(dtype).itemsize
    return max(8, 32 // max(itemsize, 1))


def _choose_row_tile(m_rows: int, row_bytes: int, sub: int,
                     budget_bytes: int) -> int:
    """Largest sublane-multiple row tile with ~budget bytes (in+out) per block,
    capped so big problems keep >= 4 grid steps (megacore + double buffering)."""
    tm = (budget_bytes // max(row_bytes, 1)) // sub * sub
    tm = max(tm, sub)
    if m_rows >= 4 * sub:
        tm = min(tm, _round_up(pl.cdiv(m_rows, 4), sub))
    if tm >= m_rows:
        return m_rows
    return tm


def product_layer_forward(
    x: jax.Array,
    in_regions: int,
    in_nodes: int,
    row_tile: int | None = None,
) -> jax.Array:
    """Pallas implementation of ProductLayer.forward.

    x: (batch, in_regions, in_nodes)
    returns: (batch, in_regions // 2, in_nodes ** 2)
    """
    assert x.ndim == 3
    B, R, N = x.shape
    assert R == in_regions and N == in_nodes
    assert R % 2 == 0, "ProductLayer requires an even number of input regions"
    P = R // 2
    M = B * P
    NN = N * N

    # Lane-folding factor: fold k consecutive (even, odd) pairs into one row so
    # the output row is a multiple of 128 lanes (full, unmasked vector stores).
    k = 1
    if NN < 128 and 128 % NN == 0:
        k = 128 // NN
        while k > 1 and M % k != 0:   # fallback keeps correctness for ragged M
            k //= 2
    m_rows = M // k

    # 128-lane chunked stores when the layout allows it, else one chunk per pair.
    total_lanes = k * NN
    if total_lanes % 128 == 0 and 128 % N == 0:
        chunk_lanes = 128
    else:
        chunk_lanes = NN

    # Free (contiguous, row-major) reshape: each row holds k (even, odd) pairs.
    x2d = x.reshape(m_rows, k * 2 * N)

    itemsize = jnp.dtype(x.dtype).itemsize
    sub = _sublane_multiple(x.dtype)
    row_bytes = (k * 2 * N + k * NN) * itemsize       # in + out bytes per row
    budget = 12 * 1024 * 1024                          # ~12 MiB per block
    if row_tile is not None:
        tm = min(row_tile, m_rows)
        if tm < m_rows:
            tm = max(sub, tm // sub * sub)
    else:
        tm = _choose_row_tile(m_rows, row_bytes, sub, budget)
    grid = (pl.cdiv(m_rows, tm),)

    out2d = pl.pallas_call(
        functools.partial(_product_kernel, n=N, k=k, chunk_lanes=chunk_lanes),
        out_shape=jax.ShapeDtypeStruct((m_rows, k * NN), x.dtype),
        grid_spec=pltpu.PrefetchScalarGridSpec(
            num_scalar_prefetch=0,
            grid=grid,
            in_specs=[pl.BlockSpec((tm, k * 2 * N), lambda i: (i, 0))],
            out_specs=pl.BlockSpec((tm, k * NN), lambda i: (i, 0)),
        ),
        compiler_params=pltpu.CompilerParams(
            dimension_semantics=("parallel",),
            vmem_limit_bytes=48 * 1024 * 1024,
        ),
        cost_estimate=pl.CostEstimate(
            flops=M * NN,
            transcendentals=0,
            bytes_accessed=itemsize * (M * 2 * N + M * NN),
        ),
    )(x2d)

    # Glue: free row-major reshapes back to the PyTorch output layout.
    return out2d.reshape(B, P, NN)


def product_layer_reference(x: jax.Array) -> jax.Array:
    """Pure-JAX reference, mirrors the PyTorch forward exactly."""
    B, R, N = x.shape
    P = R // 2
    x1 = x[:, 0::2, :]
    x2 = x[:, 1::2, :]
    out = x1[:, :, :, None] + x2[:, :, None, :]
    return out.reshape(B, P, N * N)


if __name__ == "__main__":
    key = jax.random.PRNGKey(0)

    # 1) Small shapes consistent with the module: in_regions=4, in_nodes=8.
    #    Exercises lane folding (N*N=64 -> k=2 -> 128-lane output rows).
    batch, in_regions, in_nodes = 2, 4, 8
    x = jax.random.normal(key, (batch, in_regions, in_nodes), dtype=jnp.float32)
    out = product_layer_forward(x, in_regions, in_nodes)
    out = jax.block_until_ready(out)
    ref = product_layer_reference(x)
    assert out.shape == (batch, in_regions // 2, in_nodes ** 2), out.shape
    assert out.dtype == x.dtype, out.dtype
    assert jnp.allclose(out, ref, atol=1e-6, rtol=1e-6), "mismatch vs reference"

    # 2) Multi-step grid path with 128-lane chunked stores (N=16, k=1).
    b2, r2, n2 = 128, 8, 16          # m_rows = 512
    x_big = jax.random.normal(jax.random.PRNGKey(0), (b2, r2, n2),
                              dtype=jnp.float32)
    out_big = product_layer_forward(x_big, r2, n2, row_tile=128)  # 4 grid steps
    out_big = jax.block_until_ready(out_big)
    ref_big = product_layer_reference(x_big)
    assert jnp.allclose(out_big, ref_big, atol=1e-6, rtol=1e-6), "tiled mismatch"

    # 3) bf16 path: sublane packing multiple of 16 + lane folding + tiled grid.
    b3, r3, n3 = 64, 4, 8            # M = 128, k = 2 -> m_rows = 64
    x_bf = jax.random.normal(jax.random.PRNGKey(0), (b3, r3, n3),
                             dtype=jnp.float32).astype(jnp.bfloat16)
    out_bf = product_layer_forward(x_bf, r3, n3)
    out_bf = jax.block_until_ready(out_bf)
    ref_bf = product_layer_reference(x_bf)
    assert out_bf.dtype == jnp.bfloat16
    assert jnp.allclose(out_bf.astype(jnp.float32), ref_bf.astype(jnp.float32),
                        atol=1e-2, rtol=1e-2), "bf16 mismatch"

    print("KERNEL_OK")
</pallas_src>

<mosaic_0001>
module attributes {stable_mosaic.version = 11 : i64} {
  func.func @_product_kernel(%arg0: i32, %arg1: memref<2x32xf32, #tpu.memory_space<vmem>>, %arg2: memref<2x128xf32, #tpu.memory_space<vmem>>) attributes {dimension_semantics = [#tpu.dimension_semantics<parallel>], iteration_bounds = array<i64: 1>, scalar_prefetch = 0 : i64, scratch_operands = 0 : i64, tpu.core_type = #tpu.core_type<tc>, window_params = [{transform_indices = @transform_0, window_bounds = array<i64: 2, 32>}, {transform_indices = @transform_1, window_bounds = array<i64: 2, 128>}]} {
    %c0 = arith.constant 0 : index
    %c0_0 = arith.constant 0 : index
    %0 = vector.load %arg1[%c0, %c0_0] : memref<2x32xf32, #tpu.memory_space<vmem>>, vector<2x32xf32>
    %1 = vector.extract_strided_slice %0 {offsets = [0, 8], sizes = [2, 8], strides = [1, 1]} : vector<2x32xf32> to vector<2x8xf32>
    %2 = vector.extract_strided_slice %0 {offsets = [0, 24], sizes = [2, 8], strides = [1, 1]} : vector<2x32xf32> to vector<2x8xf32>
    %3 = vector.extract_strided_slice %0 {offsets = [0, 0], sizes = [2, 1], strides = [1, 1]} : vector<2x32xf32> to vector<2x1xf32>
    %4 = vector.broadcast %3 : vector<2x1xf32> to vector<2x8xf32>
    %5 = arith.addf %4, %1 : vector<2x8xf32>
    %6 = vector.extract_strided_slice %0 {offsets = [0, 1], sizes = [2, 1], strides = [1, 1]} : vector<2x32xf32> to vector<2x1xf32>
    %7 = vector.broadcast %6 : vector<2x1xf32> to vector<2x8xf32>
    %8 = arith.addf %7, %1 : vector<2x8xf32>
    %9 = vector.extract_strided_slice %0 {offsets = [0, 2], sizes = [2, 1], strides = [1, 1]} : vector<2x32xf32> to vector<2x1xf32>
    %10 = vector.broadcast %9 : vector<2x1xf32> to vector<2x8xf32>
    %11 = arith.addf %10, %1 : vector<2x8xf32>
    %12 = vector.extract_strided_slice %0 {offsets = [0, 3], sizes = [2, 1], strides = [1, 1]} : vector<2x32xf32> to vector<2x1xf32>
    %13 = vector.broadcast %12 : vector<2x1xf32> to vector<2x8xf32>
    %14 = arith.addf %13, %1 : vector<2x8xf32>
    %15 = vector.extract_strided_slice %0 {offsets = [0, 4], sizes = [2, 1], strides = [1, 1]} : vector<2x32xf32> to vector<2x1xf32>
    %16 = vector.broadcast %15 : vector<2x1xf32> to vector<2x8xf32>
    %17 = arith.addf %16, %1 : vector<2x8xf32>
    %18 = vector.extract_strided_slice %0 {offsets = [0, 5], sizes = [2, 1], strides = [1, 1]} : vector<2x32xf32> to vector<2x1xf32>
    %19 = vector.broadcast %18 : vector<2x1xf32> to vector<2x8xf32>
    %20 = arith.addf %19, %1 : vector<2x8xf32>
    %21 = vector.extract_strided_slice %0 {offsets = [0, 6], sizes = [2, 1], strides = [1, 1]} : vector<2x32xf32> to vector<2x1xf32>
    %22 = vector.broadcast %21 : vector<2x1xf32> to vector<2x8xf32>
    %23 = arith.addf %22, %1 : vector<2x8xf32>
    %24 = vector.extract_strided_slice %0 {offsets = [0, 7], sizes = [2, 1], strides = [1, 1]} : vector<2x32xf32> to vector<2x1xf32>
    %25 = vector.broadcast %24 : vector<2x1xf32> to vector<2x8xf32>
    %26 = arith.addf %25, %1 : vector<2x8xf32>
    %27 = vector.extract_strided_slice %0 {offsets = [0, 16], sizes = [2, 1], strides = [1, 1]} : vector<2x32xf32> to vector<2x1xf32>
    %28 = vector.broadcast %27 : vector<2x1xf32> to vector<2x8xf32>
    %29 = arith.addf %28, %2 : vector<2x8xf32>
    %30 = vector.extract_strided_slice %0 {offsets = [0, 17], sizes = [2, 1], strides = [1, 1]} : vector<2x32xf32> to vector<2x1xf32>
    %31 = vector.broadcast %30 : vector<2x1xf32> to vector<2x8xf32>
    %32 = arith.addf %31, %2 : vector<2x8xf32>
    %33 = vector.extract_strided_slice %0 {offsets = [0, 18], sizes = [2, 1], strides = [1, 1]} : vector<2x32xf32> to vector<2x1xf32>
    %34 = vector.broadcast %33 : vector<2x1xf32> to vector<2x8xf32>
    %35 = arith.addf %34, %2 : vector<2x8xf32>
    %36 = vector.extract_strided_slice %0 {offsets = [0, 19], sizes = [2, 1], strides = [1, 1]} : vector<2x32xf32> to vector<2x1xf32>
    %37 = vector.broadcast %36 : vector<2x1xf32> to vector<2x8xf32>
    %38 = arith.addf %37, %2 : vector<2x8xf32>
    %39 = vector.extract_strided_slice %0 {offsets = [0, 20], sizes = [2, 1], strides = [1, 1]} : vector<2x32xf32> to vector<2x1xf32>
    %40 = vector.broadcast %39 : vector<2x1xf32> to vector<2x8xf32>
    %41 = arith.addf %40, %2 : vector<2x8xf32>
    %42 = vector.extract_strided_slice %0 {offsets = [0, 21], sizes = [2, 1], strides = [1, 1]} : vector<2x32xf32> to vector<2x1xf32>
    %43 = vector.broadcast %42 : vector<2x1xf32> to vector<2x8xf32>
    %44 = arith.addf %43, %2 : vector<2x8xf32>
    %45 = vector.extract_strided_slice %0 {offsets = [0, 22], sizes = [2, 1], strides = [1, 1]} : vector<2x32xf32> to vector<2x1xf32>
    %46 = vector.broadcast %45 : vector<2x1xf32> to vector<2x8xf32>
    %47 = arith.addf %46, %2 : vector<2x8xf32>
    %48 = vector.extract_strided_slice %0 {offsets = [0, 23], sizes = [2, 1], strides = [1, 1]} : vector<2x32xf32> to vector<2x1xf32>
    %49 = vector.broadcast %48 : vector<2x1xf32> to vector<2x8xf32>
    %50 = arith.addf %49, %2 : vector<2x8xf32>
    %51 = tpu.concatenate %5, %8, %11, %14, %17, %20, %23, %26, %29, %32, %35, %38, %41, %44, %47, %50 in 1 : vector<2x8xf32>, vector<2x8xf32>, vector<2x8xf32>, vector<2x8xf32>, vector<2x8xf32>, vector<2x8xf32>, vector<2x8xf32>, vector<2x8xf32>, vector<2x8xf32>, vector<2x8xf32>, vector<2x8xf32>, vector<2x8xf32>, vector<2x8xf32>, vector<2x8xf32>, vector<2x8xf32>, vector<2x8xf32> -> vector<2x128xf32>
    %c0_1 = arith.constant 0 : index
    %c0_2 = arith.constant 0 : index
    %52 = vector.load %arg2[%c0_1, %c0_2] : memref<2x128xf32, #tpu.memory_space<vmem>>, vector<2x128xf32>
    tpu.vector_store %arg2[%c0_1, %c0_2], %51 {strides = array<i32>} : memref<2x128xf32, #tpu.memory_space<vmem>>, vector<2x128xf32>,
    return
  }
  func.func @transform_0(%arg0: i32) -> (i32, i32) {
    %c0_i32 = arith.constant 0 : i32
    %c0_i32_0 = arith.constant 0 : i32
    return %arg0, %c0_i32 : i32, i32
  }
  func.func @transform_1(%arg0: i32) -> (i32, i32) {
    %c0_i32 = arith.constant 0 : i32
    %c0_i32_0 = arith.constant 0 : i32
    return %arg0, %c0_i32 : i32, i32
  }
}

</mosaic_0001>

<bundles_post_ra>
// kernel: tpu_custom_call.1
= control target key start
LH: loop header
LB: loop body
LE: loop exit
PB: predicated region body
PF: predicated region fallthrough
CT: control target
= control target key end

     0   :  { %6 = vsyncpa [#allocation3], 0  ;;  %s381_s0 = inlined_call_operand.hbm [shape: f32[2,32], index: 0, kind: input, shape index: {}]   ;;  %s382_s1 = inlined_call_operand.hbm [shape: f32[2,128], index: 1, kind: output, shape index: {}]  }
   0x1   :  { %7 = vsyncpa [#allocation4], 0  ;;  %s300_s6 = smov [#allocation2]  }
   0x2   :  { %s14_s7 = sshll.u32 %s300_s6, 4  ;;  %s15_s7 = int_to_ptr.vmem [resolvable:$true] %s14_s7 }
   0x3   :  { %s264_s8 = scalar_lea.vmem %s15_s7, 32  ;;  %p269_p1 = scmp.lt.s32.totalorder %s15_s7, %s15_s7 }
   0x4   :  { %p265_p0 = scmp.ne.s32.totalorder %s15_s7, %s264_s8  ;;  %p270_p2 = scmp.lt.s32.totalorder %s264_s8, %s264_s8 }
   0x6   :  { %p271_p3 = por %p270_p2, %p269_p1 }
   0x8   :  { %p272_p4 = pnand %p271_p3, %p265_p0 }
   0xa   :  { %275 = shalt.err (!%p272_p4)
}
   0xb   :  { %17 = dma.hbm_to_vmem [thread:$0]  %s381_s0, 32, %s15_s7, [#allocation3]  }
   0xc   :  { %296 = dma.done.wait [#allocation3], 32  }
   0xd   :  { %297 = vsyncadd [#allocation3], 4294967264  ;;  %v301_v0 = vmov 3   ;;  %v302_v1 = vmov 0   ;;  %v344_v2 = vld [vmem:[#allocation2] sm:$0x3] }
   0xe   :  { %242 = vset.pattern.permute.xlu1 %v301_v0  ;;  %240 = vset.pattern.permute.xlu0 %v302_v1  ;;  %v303_v3 = vmov 4   ;;  %v304_v4 = vmov 2   ;;  %v305_v5 = vmov 5   ;;  %v306_v6 = vmov 6   ;;  %s317_s0 = smov 120   ;;  %s318_s11 = smov 16  }
   0xf   :  { %39 = vperm.xlu1 %242, %v344_v2   ;;  %24 = vperm.xlu0 %240, %v344_v2   ;;  %v307_v7 = vmov 7   ;;  %v308_v8 = vmov 17   ;;  %v309_v9 = vmov 16   ;;  %v310_v10 = vmov 20   ;;  %s319_s12 = smov 8   ;;  %s320_s13 = smov 24  }
  0x10   :  { %v311_v11 = vmov 18   ;;  %v312_v12 = vmov 23   ;;  %v313_v13 = vmov 19   ;;  %v314_v14 = vmov 21   ;;  %s321_s14 = smov 32   ;;  %s322_s15 = smov 40  }
  0x11   :  { %v315_v15 = vmov 22   ;;  %v316_v16 = vmov 1   ;;  %s323_s16 = smov 48   ;;  %s324_s17 = smov 56   ;;  %vm163_vm0 = vcmask 64512   ;;  %vm165_vm1 = vcmask 130048  }
  0x12   :  { %s325_s18 = smov 72   ;;  %s326_s19 = smov 64   ;;  %vm167_vm2 = vcmask 195584   ;;  %vm169_vm3 = vcmask 261120   ;;  %vm171_vm4 = vcmask 326656   ;;  %vm173_vm5 = vcmask 392192  }
  0x13   :  { %243 = vset.pattern.permute.xlu1 %v303_v3  ;;  %241 = vset.pattern.permute.xlu0 %v304_v4  ;;  %s327_s20 = smov 80   ;;  %s328_s21 = smov 96   ;;  %vm175_vm6 = vcmask 457728   ;;  %vm177_vm7 = vcmask 523264   ;;  %vm179_vm8 = vcmask 588800   ;;  %vm181_vm9 = vcmask 654336  }
  0x14   :  { %44 = vperm.xlu1 %243, %v344_v2   ;;  %34 = vperm.xlu0 %241, %v344_v2   ;;  %s329_s22 = smov 88   ;;  %vm183_vm10 = vcmask 719872   ;;  %vm185_vm11 = vcmask 785408   ;;  %vm187_vm12 = vcmask 850944   ;;  %vm189_vm13 = vcmask 916480   ;;  %s330_s23 = smov [#allocation5]  }
  0x15   :  { %s200_s24 = sshll.u32 %s330_s23, 4  ;;  %vm191_vm14 = vcmask 982016   ;;  %s201_s24 = int_to_ptr.vmem [resolvable:$true] %s200_s24 }
  0x16   :  { %s276_s25 = scalar_lea.vmem %s201_s24, 32  ;;  %p281_p6 = scmp.lt.s32.totalorder %s201_s24, %s201_s24 }
  0x17   :  { %p277_p5 = scmp.ne.s32.totalorder %s201_s24, %s276_s25  ;;  %p282_p7 = scmp.lt.s32.totalorder %s276_s25, %s276_s25 }
  0x18   :  { %244 = vset.pattern.permute.xlu1 %v305_v5  ;;  %245 = vset.pattern.permute.xlu0 %v306_v6 }
  0x19   :  { %49 = vperm.xlu1 %244, %v344_v2   ;;  %54 = vperm.xlu0 %245, %v344_v2   ;;  %p283_p8 = por %p282_p7, %p281_p6 }
  0x1b   :  { %p284_p9 = pnand %p283_p8, %p277_p5 }
  0x1d   :  { %246 = vset.pattern.permute.xlu1 %v307_v7  ;;  %248 = vset.pattern.permute.xlu0 %v308_v8 }
  0x1e   :  { %59 = vperm.xlu1 %246, %v344_v2   ;;  %69 = vperm.xlu0 %248, %v344_v2  }
  0x22   :  { %247 = vset.pattern.permute.xlu1 %v309_v9  ;;  %251 = vset.pattern.permute.xlu0 %v310_v10 }
  0x23   :  { %64 = vperm.xlu1 %247, %v344_v2   ;;  %84 = vperm.xlu0 %251, %v344_v2  }
  0x27   :  { %249 = vset.pattern.permute.xlu1 %v311_v11  ;;  %254 = vset.pattern.permute.xlu0 %v312_v12 }
  0x28   :  { %74 = vperm.xlu1 %249, %v344_v2   ;;  %99 = vperm.xlu0 %254, %v344_v2  }
  0x2c   :  { %250 = vset.pattern.permute.xlu1 %v313_v13 }
  0x2d   :  { %79 = vperm.xlu1 %250, %v344_v2  }
  0x31   :  { %252 = vset.pattern.permute.xlu1 %v314_v14 }
  0x32   :  { %89 = vperm.xlu1 %252, %v344_v2  }
  0x36   :  { %253 = vset.pattern.permute.xlu1 %v315_v15 }
  0x37   :  { %94 = vperm.xlu1 %253, %v344_v2  }
  0x3b   :  { %255 = vset.pattern.permute.xlu1 %v316_v16 }
  0x3c   :  { %29 = vperm.xlu1 %255, %v344_v2  }
  0x8a   :  { %v40_v17 = vpop.permute.xlu1 %39  ;;  %v25_v18 = vpop.permute.xlu0 %24 }
  0x8b   :  { %v27_v19 = vadd.f32 %v25_v18, %v344_v2  ;;  %v42_v20 = vadd.f32 %v40_v17, %v344_v2 }
  0x8d   :  { %104 = vrot.lane.b32.xlu1 %v27_v19, %s317_s0 }
  0x8f   :  { %v45_v21 = vpop.permute.xlu1 %44  ;;  %v35_v22 = vpop.permute.xlu0 %34 }
  0x90   :  { %v37_v23 = vadd.f32 %v35_v22, %v344_v2  ;;  %v47_v24 = vadd.f32 %v45_v21, %v344_v2 }
  0x91   :  { %112 = vrot.lane.b32.xlu1 %v42_v20, %s318_s11 }
  0x92   :  { %108 = vrot.lane.b32.xlu0 %v37_v23, %s319_s12 }
  0x94   :  { %v50_v25 = vpop.permute.xlu1 %49  ;;  %v55_v26 = vpop.permute.xlu0 %54 }
  0x95   :  { %v52_v27 = vadd.f32 %v50_v25, %v344_v2  ;;  %v57_v28 = vadd.f32 %v55_v26, %v344_v2 }
  0x96   :  { %116 = vrot.lane.b32.xlu0 %v47_v24, %s320_s13 }
  0x97   :  { %120 = vrot.lane.b32.xlu1 %v52_v27, %s321_s14 }
  0x99   :  { %v60_v29 = vpop.permute.xlu1 %59  ;;  %v70_v30 = vpop.permute.xlu0 %69 }
  0x9a   :  { %v62_v31 = vadd.f32 %v60_v29, %v344_v2  ;;  %124 = vrot.lane.b32.xlu0 %v57_v28, %s322_s15  ;;  %v72_v32 = vadd.f32 %v70_v30, %v344_v2 }
  0x9c   :  { %128 = vrot.lane.b32.xlu1 %v62_v31, %s323_s16 }
  0x9e   :  { %v65_v33 = vpop.permute.xlu1 %64  ;;  %v85_v36 = vpop.permute.xlu0 %84 }
  0x9f   :  { %v67_v34 = vadd.f32 %v65_v33, %v344_v2  ;;  %v87_v38 = vadd.f32 %v85_v36, %v344_v2 }
  0xa0   :  { %136 = vrot.lane.b32.xlu1 %v72_v32, %s323_s16 }
  0xa1   :  { %132 = vrot.lane.b32.xlu0 %v67_v34, %s322_s15 }
  0xa3   :  { %v75_v35 = vpop.permute.xlu1 %74  ;;  %v100_v42 = vpop.permute.xlu0 %99 }
  0xa4   :  { %v77_v37 = vadd.f32 %v75_v35, %v344_v2  ;;  %v102_v44 = vadd.f32 %v100_v42, %v344_v2 }
  0xa6   :  { %140 = vrot.lane.b32.xlu0 %v77_v37, %s324_s17 }
  0xa8   :  { %v80_v39 = vpop.permute.xlu1 %79 }
  0xa9   :  { %v82_v40 = vadd.f32 %v80_v39, %v344_v2 }
  0xaa   :  { %148 = vrot.lane.b32.xlu0 %v87_v38, %s325_s18 }
  0xab   :  { %144 = vrot.lane.b32.xlu1 %v82_v40, %s326_s19 }
  0xad   :  { %v90_v41 = vpop.permute.xlu1 %89 }
  0xae   :  { %v92_v43 = vadd.f32 %v90_v41, %v344_v2 }
  0xb0   :  { %152 = vrot.lane.b32.xlu1 %v92_v43, %s327_s20 }
  0xb2   :  { %v95_v45 = vpop.permute.xlu1 %94 }
  0xb3   :  { %v97_v46 = vadd.f32 %v95_v45, %v344_v2 }
  0xb4   :  { %160 = vrot.lane.b32.xlu1 %v102_v44, %s328_s21 }
  0xb5   :  { %156 = vrot.lane.b32.xlu0 %v97_v46, %s329_s22 }
  0xb7   :  { %v30_v47 = vpop.permute.xlu1 %29 }
  0xb8   :  { %v32_v50 = vadd.f32 %v30_v47, %v344_v2 }
  0xff   :  { %v105_v48 = vpop.permute.xlu1 %104 }
 0x100   :  { %v164_v52 = vsel %vm163_vm0, %v105_v48, %v32_v50 }
 0x103   :  { %v113_v51 = vpop.permute.xlu1 %112 }
 0x104   :  { %v109_v49 = vpop.permute.xlu0 %108 }
 0x105   :  { %v166_v55 = vsel %vm165_vm1, %v164_v52, %v109_v49 }
 0x106   :  { %v168_v56 = vsel %vm167_vm2, %v166_v55, %v113_v51 }
 0x108   :  { %v117_v53 = vpop.permute.xlu0 %116 }
 0x109   :  { %v121_v54 = vpop.permute.xlu1 %120  ;;  %v170_v59 = vsel %vm169_vm3, %v168_v56, %v117_v53 }
 0x10a   :  { %v172_v60 = vsel %vm171_vm4, %v170_v59, %v121_v54 }
 0x10c   :  { %v125_v57 = vpop.permute.xlu0 %124 }
 0x10d   :  { %v174_v63 = vsel %vm173_vm5, %v172_v60, %v125_v57 }
 0x10e   :  { %v129_v58 = vpop.permute.xlu1 %128 }
 0x10f   :  { %v176_v0 = vsel %vm175_vm6, %v174_v63, %v129_v58 }
 0x112   :  { %v137_v62 = vpop.permute.xlu1 %136 }
 0x113   :  { %v133_v61 = vpop.permute.xlu0 %132 }
 0x114   :  { %v178_v2 = vsel %vm177_vm7, %v176_v0, %v133_v61 }
 0x115   :  { %v180_v4 = vsel %vm179_vm8, %v178_v2, %v137_v62 }
 0x118   :  { %v141_v3 = vpop.permute.xlu0 %140 }
 0x119   :  { %v182_v5 = vsel %vm181_vm9, %v180_v4, %v141_v3 }
 0x11c   :  { %v149_v8 = vpop.permute.xlu0 %148 }
 0x11d   :  { %v145_v1 = vpop.permute.xlu1 %144 }
 0x11e   :  { %v184_v7 = vsel %vm183_vm10, %v182_v5, %v145_v1 }
 0x11f   :  { %v186_v9 = vsel %vm185_vm11, %v184_v7, %v149_v8 }
 0x122   :  { %v153_v6 = vpop.permute.xlu1 %152 }
 0x123   :  { %v188_v11 = vsel %vm187_vm12, %v186_v9, %v153_v6 }
 0x126   :  { %v161_v10 = vpop.permute.xlu1 %160 }
 0x127   :  { %v157_v12 = vpop.permute.xlu0 %156 }
 0x128   :  { %v190_v13 = vsel %vm189_vm13, %v188_v11, %v157_v12 }
 0x129   :  { %v192_v14 = vsel %vm191_vm14, %v190_v13, %v161_v10 }
 0x12a   :  { %193 = vst [vmem:[#allocation5] sm:$0x3] %v192_v14 }
 0x12b   :  { %287 = shalt.err (!%p284_p9)
}
 0x12c   :  { %203 = dma.vmem_to_hbm [thread:$0]  %s201_s24, 32, %s382_s1, [#allocation4]  }
 0x12d   :  { %298 = dma.done.wait [#allocation4], 32  }
 0x12e   :  { %299 = vsyncadd [#allocation4], 4294967264 }
 0x12f   :  { %207 = vsyncpa [#allocation3], 1 }
 0x130   :  { %208 = vsyncpa [#allocation4], 1 }

</bundles_post_ra>
